<compile_context>
chip_gen: v7x
topology: tpu7x:2x2x1
jax: 0.10.0
libtpu: 0.0.40
codegen_flags: <defaults>
</compile_context>

<pallas_src>
import functools

import jax
import jax.numpy as jnp
from jax.experimental import pallas as pl
from jax.experimental.pallas import tpu as pltpu

_SELU_ALPHA = 1.6732632423543772848170429916717
_SELU_SCALE = 1.0507009873554804934193349852946
_NEG_BIG = -1e30  # mask value for padded lanes ahead of an inner softmax


def _round_up(x, m):
    return ((x + m - 1) // m) * m


def _cdiv(a, b):
    return -(-a // b)


def _masked_softmax(y, true_dim):
    """Stable softmax over the last axis, ignoring zero-padded lanes."""
    if true_dim != y.shape[-1]:
        col = jax.lax.broadcasted_iota(jnp.int32, y.shape, y.ndim - 1)
        y = jnp.where(col < true_dim, y, _NEG_BIG)
    m = jnp.max(y, axis=-1, keepdims=True)
    e = jnp.exp(y - m)
    return e / jnp.sum(e, axis=-1, keepdims=True)


def _apply_activation(y, activation_name, true_dim):
    """Elementwise / row-wise activation, traced inside the kernel."""
    if activation_name == "relu":
        return jnp.maximum(y, 0.0)
    elif activation_name == "tanh":
        return jnp.tanh(y)
    elif activation_name == "sigmoid":
        return jax.nn.sigmoid(y)
    elif activation_name == "selu":
        return _SELU_SCALE * jnp.where(y > 0.0, y, _SELU_ALPHA * jnp.expm1(y))
    elif activation_name == "linear":
        return y
    elif activation_name == "softmax":  # torch Softmax(dim=1) used as activation
        return _masked_softmax(y, true_dim)
    else:
        raise ValueError(f"unknown activation: {activation_name}")


def _fused_mlp_kernel(*refs, activations, true_dims, out_dim):
    """refs = (x, w0, b0, w1, b1, ..., o).  Whole forward pass in one body."""
    x_ref = refs[0]
    o_ref = refs[-1]
    h = x_ref[...]
    for li, act in enumerate(activations):
        w = refs[1 + 2 * li][...]
        b = refs[2 + 2 * li][...]  # (1, out) -> broadcasts over the batch tile
        y = jnp.dot(h, w, preferred_element_type=jnp.float32) + b
        h = _apply_activation(y, act, true_dims[li + 1])
    # Final Softmax(dim=1) of Net.forward (2-D input path): slice away the
    # lane padding first (the output block is unpadded), then an EXACT softmax
    # so returned probability rows sum to 1 to f32 precision.
    logits = h[:, :out_dim] if out_dim != h.shape[-1] else h
    m = jnp.max(logits, axis=-1, keepdims=True)
    e = jnp.exp(logits - m)
    o_ref[...] = (e / jnp.sum(e, axis=-1, keepdims=True)).astype(o_ref.dtype)


def make_net_forward(params, input_size, layers_specs, *, max_tile_b=1024):
    """Pads parameters ONCE and returns a jitted forward(x) for 2-D inputs.

    Equivalent to Net.forward for (batch, features) input.
    """
    # TODO(synk): 3-D input path (torch Softmax(dim=2)) not implemented here.
    acts = tuple(spec["activation"] for spec in layers_specs)
    dims = [input_size] + [int(spec["neurons"]) for spec in layers_specs]
    # Pad OUTPUT widths of every layer to 128 lanes; the first layer's input
    # width stays unpadded (x is passed unpadded, MXU handles small K fine).
    pdims = [dims[0]] + [_round_up(d, 128) for d in dims[1:]]

    # --- one-time parameter padding (hoisted off the per-call critical path)
    flat = []
    for li, (w, b) in enumerate(params):
        wp = (
            jnp.zeros((pdims[li], pdims[li + 1]), jnp.float32)
            .at[: dims[li], : dims[li + 1]]
            .set(w)
        )
        bpad = (
            jnp.zeros((1, pdims[li + 1]), jnp.float32)
            .at[:, : dims[li + 1]]
            .set(b.reshape(1, -1))
        )
        flat += [wp, bpad]
    flat = tuple(jax.device_put(p) for p in flat)

    kernel = functools.partial(
        _fused_mlp_kernel,
        activations=acts,
        true_dims=tuple(dims),
        out_dim=dims[-1],
    )

    @jax.jit
    def forward(x):
        batch, in_dim = x.shape
        assert in_dim == dims[0], "input feature size mismatch"
        x = x.astype(jnp.float32)

        # Balanced batch tiling: avoid up-to-a-tile of junk rows, and keep at
        # least 2 tiles (when batch allows) so both v7x TensorCores get work.
        num_tiles = _cdiv(batch, max_tile_b)
        if batch >= 16:
            num_tiles = max(num_tiles, 2)
        tile_b = _round_up(_cdiv(batch, num_tiles), 8)
        bp = _round_up(batch, tile_b)
        if bp != batch:
            x = jnp.pad(x, ((0, bp - batch), (0, 0)))

        # x is tiled over the batch; weights/biases stay at block (0, 0) for
        # every grid step, i.e. resident in VMEM across the whole grid.
        # (If layer widths ever scale, store params in bf16 and mark these
        #  constant-index specs pl.Buffered(1) to halve resident VMEM on v7x.)
        in_specs = [pl.BlockSpec((tile_b, dims[0]), lambda i: (i, 0))]
        in_specs += [pl.BlockSpec(p.shape, lambda i: (0, 0)) for p in flat]

        out = pl.pallas_call(
            kernel,
            out_shape=jax.ShapeDtypeStruct((bp, dims[-1]), jnp.float32),
            grid=(bp // tile_b,),
            in_specs=in_specs,
            out_specs=pl.BlockSpec((tile_b, dims[-1]), lambda i: (i, 0)),
            compiler_params=pltpu.CompilerParams(
                dimension_semantics=("parallel",)  # batch tiles shard across TCs (v7x)
            ),
        )(x, *flat)
        return out[:batch] if bp != batch else out

    return forward


def init_params(key, input_size, layers_specs):
    """Deterministic parameter init matching nn.Linear shapes (transposed)."""
    params = []
    current_dim = input_size
    for spec in layers_specs:
        out_dim = spec["neurons"]
        key, kw, kb = jax.random.split(key, 3)
        bound = 1.0 / jnp.sqrt(current_dim)  # torch default U(-1/sqrt(in), 1/sqrt(in))
        w = jax.random.uniform(
            kw, (current_dim, out_dim), jnp.float32, minval=-bound, maxval=bound
        )
        b = jax.random.uniform(
            kb, (1, out_dim), jnp.float32, minval=-bound, maxval=bound
        )
        params.append((w, b))
        current_dim = out_dim
    return params


def _reference_forward(x, params, layers_specs):
    """Pure-JAX reference matching Net.forward (2-D input path)."""
    h = x
    for (w, b), spec in zip(params, layers_specs):
        y = h @ w + b.reshape(1, -1)
        name = spec["activation"]
        if name == "relu":
            h = jnp.maximum(y, 0.0)
        elif name == "tanh":
            h = jnp.tanh(y)
        elif name == "sigmoid":
            h = jax.nn.sigmoid(y)
        elif name == "selu":
            h = _SELU_SCALE * jnp.where(y > 0.0, y, _SELU_ALPHA * jnp.expm1(y))
        elif name == "linear":
            h = y
        elif name == "softmax":
            h = jax.nn.softmax(y, axis=-1)
        else:
            raise ValueError(name)
    return jax.nn.softmax(h, axis=-1)


if __name__ == "__main__":
    input_size = 32
    layers_specs = [
        {"neurons": 64, "activation": "relu"},
        {"neurons": 32, "activation": "tanh"},
        {"neurons": 16, "activation": "linear"},
    ]

    key = jax.random.PRNGKey(0)
    key, kx1, kx2 = jax.random.split(key, 3)
    params = init_params(key, input_size, layers_specs)
    forward = make_net_forward(params, input_size, layers_specs)

    # Small single-tile batch.
    batch = 8
    x = jax.random.normal(kx1, (batch, input_size), jnp.float32)
    out = jax.block_until_ready(forward(x))
    assert out.shape == (batch, layers_specs[-1]["neurons"])
    assert jnp.allclose(jnp.sum(out, axis=-1), 1.0, atol=1e-4)
    ref = _reference_forward(x, params, layers_specs)
    assert jnp.allclose(out, ref, atol=2e-3, rtol=2e-3)

    # Multi-tile batch with tail padding (exercises balanced tiling + 2 tiles).
    batch2 = 20
    x2 = jax.random.normal(kx2, (batch2, input_size), jnp.float32)
    out2 = jax.block_until_ready(forward(x2))
    assert out2.shape == (batch2, layers_specs[-1]["neurons"])
    assert jnp.allclose(jnp.sum(out2, axis=-1), 1.0, atol=1e-4)
    ref2 = _reference_forward(x2, params, layers_specs)
    assert jnp.allclose(out2, ref2, atol=2e-3, rtol=2e-3)

    print("KERNEL_OK")
</pallas_src>

<mosaic_0001>
module attributes {stable_mosaic.version = 11 : i64} {
  func.func @_fused_mlp_kernel(%arg0: i32, %arg1: memref<8x32xf32, #tpu.memory_space<vmem>>, %arg2: memref<32x128xf32, #tpu.memory_space<vmem>>, %arg3: memref<1x128xf32, #tpu.memory_space<vmem>>, %arg4: memref<128x128xf32, #tpu.memory_space<vmem>>, %arg5: memref<1x128xf32, #tpu.memory_space<vmem>>, %arg6: memref<128x128xf32, #tpu.memory_space<vmem>>, %arg7: memref<1x128xf32, #tpu.memory_space<vmem>>, %arg8: memref<8x16xf32, #tpu.memory_space<vmem>>) attributes {dimension_semantics = [#tpu.dimension_semantics<parallel>], iteration_bounds = array<i64: 1>, scalar_prefetch = 0 : i64, scratch_operands = 0 : i64, tpu.core_type = #tpu.core_type<tc>, window_params = [{transform_indices = @transform_0, window_bounds = array<i64: 8, 32>}, {pipeline_mode = #tpu.pipeline_mode<synchronous>, transform_indices = @transform_1, window_bounds = array<i64: 32, 128>}, {pipeline_mode = #tpu.pipeline_mode<synchronous>, transform_indices = @transform_2, window_bounds = array<i64: 1, 128>}, {pipeline_mode = #tpu.pipeline_mode<synchronous>, transform_indices = @transform_3, window_bounds = array<i64: 128, 128>}, {pipeline_mode = #tpu.pipeline_mode<synchronous>, transform_indices = @transform_4, window_bounds = array<i64: 1, 128>}, {pipeline_mode = #tpu.pipeline_mode<synchronous>, transform_indices = @transform_5, window_bounds = array<i64: 128, 128>}, {pipeline_mode = #tpu.pipeline_mode<synchronous>, transform_indices = @transform_6, window_bounds = array<i64: 1, 128>}, {transform_indices = @transform_7, window_bounds = array<i64: 8, 16>}]} {
    %c0 = arith.constant 0 : index
    %c0_0 = arith.constant 0 : index
    %0 = vector.load %arg1[%c0, %c0_0] : memref<8x32xf32, #tpu.memory_space<vmem>>, vector<8x32xf32>
    %c0_1 = arith.constant 0 : index
    %c0_2 = arith.constant 0 : index
    %1 = vector.load %arg2[%c0_1, %c0_2] : memref<32x128xf32, #tpu.memory_space<vmem>>, vector<32x128xf32>
    %c0_3 = arith.constant 0 : index
    %c0_4 = arith.constant 0 : index
    %2 = vector.load %arg3[%c0_3, %c0_4] : memref<1x128xf32, #tpu.memory_space<vmem>>, vector<1x128xf32>
    %cst = arith.constant dense<0.000000e+00> : vector<8x128xf32>
    %3 = tpu.matmul %0, %1, %cst {dimension_numbers = #tpu.dot_dimension_numbers<[1], [0], [0], [1], [0, 0, 1, 1], [], []>} : vector<8x32xf32>, vector<32x128xf32>, vector<8x128xf32> -> vector<8x128xf32>
    %4 = vector.broadcast %2 : vector<1x128xf32> to vector<8x128xf32>
    %5 = arith.addf %3, %4 : vector<8x128xf32>
    %cst_5 = arith.constant 0.000000e+00 : f32
    %6 = vector.broadcast %cst_5 : f32 to vector<8x128xf32>
    %7 = arith.maximumf %5, %6 : vector<8x128xf32>
    %c0_6 = arith.constant 0 : index
    %c0_7 = arith.constant 0 : index
    %8 = vector.load %arg4[%c0_6, %c0_7] : memref<128x128xf32, #tpu.memory_space<vmem>>, vector<128x128xf32>
    %c0_8 = arith.constant 0 : index
    %c0_9 = arith.constant 0 : index
    %9 = vector.load %arg5[%c0_8, %c0_9] : memref<1x128xf32, #tpu.memory_space<vmem>>, vector<1x128xf32>
    %cst_10 = arith.constant dense<0.000000e+00> : vector<8x128xf32>
    %10 = tpu.matmul %7, %8, %cst_10 {dimension_numbers = #tpu.dot_dimension_numbers<[1], [0], [0], [1], [0, 0, 1, 1], [], []>} : vector<8x128xf32>, vector<128x128xf32>, vector<8x128xf32> -> vector<8x128xf32>
    %11 = vector.broadcast %9 : vector<1x128xf32> to vector<8x128xf32>
    %12 = arith.addf %10, %11 : vector<8x128xf32>
    %13 = math.tanh %12 : vector<8x128xf32>
    %c0_11 = arith.constant 0 : index
    %c0_12 = arith.constant 0 : index
    %14 = vector.load %arg6[%c0_11, %c0_12] : memref<128x128xf32, #tpu.memory_space<vmem>>, vector<128x128xf32>
    %c0_13 = arith.constant 0 : index
    %c0_14 = arith.constant 0 : index
    %15 = vector.load %arg7[%c0_13, %c0_14] : memref<1x128xf32, #tpu.memory_space<vmem>>, vector<1x128xf32>
    %cst_15 = arith.constant dense<0.000000e+00> : vector<8x128xf32>
    %16 = tpu.matmul %13, %14, %cst_15 {dimension_numbers = #tpu.dot_dimension_numbers<[1], [0], [0], [1], [0, 0, 1, 1], [], []>} : vector<8x128xf32>, vector<128x128xf32>, vector<8x128xf32> -> vector<8x128xf32>
    %17 = vector.broadcast %15 : vector<1x128xf32> to vector<8x128xf32>
    %18 = arith.addf %16, %17 : vector<8x128xf32>
    %19 = vector.extract_strided_slice %18 {offsets = [0, 0], sizes = [8, 16], strides = [1, 1]} : vector<8x128xf32> to vector<8x16xf32>
    %cst_16 = arith.constant dense<0xFF800000> : vector<8xf32>
    %20 = vector.multi_reduction <maximumf>, %19, %cst_16 [1] : vector<8x16xf32> to vector<8xf32>
    %21 = vector.shape_cast %20 : vector<8xf32> to vector<8x1xf32>
    %22 = vector.broadcast %21 : vector<8x1xf32> to vector<8x16xf32>
    %23 = arith.subf %19, %22 : vector<8x16xf32>
    %24 = math.exp %23 : vector<8x16xf32>
    %cst_17 = arith.constant dense<0.000000e+00> : vector<8xf32>
    %25 = vector.multi_reduction <add>, %24, %cst_17 [1] : vector<8x16xf32> to vector<8xf32>
    %26 = vector.shape_cast %25 : vector<8xf32> to vector<8x1xf32>
    %27 = vector.broadcast %26 : vector<8x1xf32> to vector<8x16xf32>
    %28 = arith.divf %24, %27 : vector<8x16xf32>
    %c0_18 = arith.constant 0 : index
    %c0_19 = arith.constant 0 : index
    %29 = vector.load %arg8[%c0_18, %c0_19] : memref<8x16xf32, #tpu.memory_space<vmem>>, vector<8x16xf32>
    tpu.vector_store %arg8[%c0_18, %c0_19], %28 {strides = array<i32>} : memref<8x16xf32, #tpu.memory_space<vmem>>, vector<8x16xf32>,
    return
  }
  func.func @transform_0(%arg0: i32) -> (i32, i32) {
    %c0_i32 = arith.constant 0 : i32
    %c0_i32_0 = arith.constant 0 : i32
    return %arg0, %c0_i32 : i32, i32
  }
  func.func @transform_1(%arg0: i32) -> (i32, i32) {
    %c0_i32 = arith.constant 0 : i32
    %c0_i32_0 = arith.constant 0 : i32
    %c0_i32_1 = arith.constant 0 : i32
    return %c0_i32, %c0_i32_0 : i32, i32
  }
  func.func @transform_2(%arg0: i32) -> (i32, i32) {
    %c0_i32 = arith.constant 0 : i32
    %c0_i32_0 = arith.constant 0 : i32
    %c0_i32_1 = arith.constant 0 : i32
    return %c0_i32, %c0_i32_0 : i32, i32
  }
  func.func @transform_3(%arg0: i32) -> (i32, i32) {
    %c0_i32 = arith.constant 0 : i32
    %c0_i32_0 = arith.constant 0 : i32
    %c0_i32_1 = arith.constant 0 : i32
    return %c0_i32, %c0_i32_0 : i32, i32
  }
  func.func @transform_4(%arg0: i32) -> (i32, i32) {
    %c0_i32 = arith.constant 0 : i32
    %c0_i32_0 = arith.constant 0 : i32
    %c0_i32_1 = arith.constant 0 : i32
    return %c0_i32, %c0_i32_0 : i32, i32
  }
  func.func @transform_5(%arg0: i32) -> (i32, i32) {
    %c0_i32 = arith.constant 0 : i32
    %c0_i32_0 = arith.constant 0 : i32
    %c0_i32_1 = arith.constant 0 : i32
    return %c0_i32, %c0_i32_0 : i32, i32
  }
  func.func @transform_6(%arg0: i32) -> (i32, i32) {
    %c0_i32 = arith.constant 0 : i32
    %c0_i32_0 = arith.constant 0 : i32
    %c0_i32_1 = arith.constant 0 : i32
    return %c0_i32, %c0_i32_0 : i32, i32
  }
  func.func @transform_7(%arg0: i32) -> (i32, i32) {
    %c0_i32 = arith.constant 0 : i32
    %c0_i32_0 = arith.constant 0 : i32
    return %arg0, %c0_i32 : i32, i32
  }
}

</mosaic_0001>

<bundles_post_ra>
// kernel: forward.1
= control target key start
LH: loop header
LB: loop body
LE: loop exit
PB: predicated region body
PF: predicated region fallthrough
CT: control target
= control target key end

     0   :  { %12 = vsyncpa [#allocation3], 0  ;;  %s848_s0 = inlined_call_operand.hbm [shape: f32[8,32], index: 0, kind: input, shape index: {}]   ;;  %s849_s1 = inlined_call_operand.hbm [shape: f32[32,128], index: 1, kind: input, shape index: {}]   ;;  %s850_s2 = inlined_call_operand.vmem [shape: f32[1,128], index: 2, kind: input, shape index: {}]   ;;  %s851_s3 = inlined_call_operand.hbm [shape: f32[128,128], index: 3, kind: input, shape index: {}]   ;;  %s852_s4 = inlined_call_operand.vmem [shape: f32[1,128], index: 4, kind: input, shape index: {}]   ;;  %s853_s5 = inlined_call_operand.hbm [shape: f32[128,128], index: 5, kind: input, shape index: {}]   ;;  %s854_s6 = inlined_call_operand.vmem [shape: f32[1,128], index: 6, kind: input, shape index: {}]   ;;  %s855_s7 = inlined_call_operand.hbm [shape: f32[8,16], index: 7, kind: output, shape index: {}]  }
   0x1   :  { %13 = vsyncpa [#allocation6], 0 }
   0x2   :  { %14 = vsyncpa [#allocation9], 0 }
   0x3   :  { %15 = vsyncpa [#allocation4], 0  ;;  %s696_s24 = smov [#allocation5]   ;;  %s578_s28 = scalar_lea.hbm %s849_s1, 512 }
   0x4   :  { %s31_s25 = sshll.u32 %s696_s24, 4  ;;  %p579_p0 = scmp.ne.s32.totalorder %s849_s1, %s578_s28  ;;  %s32_s25 = int_to_ptr.vmem [resolvable:$true] %s31_s25 }
   0x5   :  { %p582_p1 = scmp.lt.u32.totalorder %s578_s28, %s849_s1 }
   0x7   :  { %p584_p2 = pnand %p582_p1, %p579_p0 }
   0x9   :  { %587 = shalt.err (!%p584_p2)
}
   0xa   :  { %s588_s10 = scalar_lea.vmem %s32_s25, 512  ;;  %p593_p4 = scmp.lt.s32.totalorder %s32_s25, %s32_s25 }
   0xb   :  { %p589_p3 = scmp.ne.s32.totalorder %s32_s25, %s588_s10  ;;  %p594_p5 = scmp.lt.s32.totalorder %s588_s10, %s588_s10 }
   0xd   :  { %p595_p6 = por %p594_p5, %p593_p4 }
   0xf   :  { %p596_p7 = pnand %p595_p6, %p589_p3 }
  0x11   :  { %599 = shalt.err (!%p596_p7)
}
  0x12   :  { %s697_s11 = smov 128   ;;  %s698_s12 = smov 8  }
  0x13   :  { %37 = dma.hbm_to_vmem [thread:$0]  %s849_s1, 512, %s32_s25, [#allocation6], %s697_s11, %s697_s11, %s698_s12  }
  0x14   :  { %s699_s15 = smov [#allocation2]   ;;  %s700_s17 = smov [#allocation7]  }
  0x15   :  { %s22_s16 = sshll.u32 %s699_s15, 4  ;;  %s45_s18 = sshll.u32 %s700_s17, 4  ;;  %s23_s16 = int_to_ptr.vmem [resolvable:$true] %s22_s16  ;;  %s46_s18 = int_to_ptr.vmem [resolvable:$true] %s45_s18 }
  0x16   :  { %s600_s21 = scalar_lea.hbm %s848_s0, 128 }
  0x17   :  { %p601_p8 = scmp.ne.s32.totalorder %s848_s0, %s600_s21  ;;  %p604_p9 = scmp.lt.u32.totalorder %s600_s21, %s848_s0 }
  0x19   :  { %p606_p10 = pnand %p604_p9, %p601_p8 }
  0x1b   :  { %609 = shalt.err (!%p606_p10)
}
  0x1c   :  { %s610_s1 = scalar_lea.vmem %s23_s16, 128  ;;  %p615_p12 = scmp.lt.s32.totalorder %s23_s16, %s23_s16 }
  0x1d   :  { %p611_p11 = scmp.ne.s32.totalorder %s23_s16, %s610_s1  ;;  %p616_p13 = scmp.lt.s32.totalorder %s610_s1, %s610_s1 }
  0x1f   :  { %p617_p0 = por %p616_p13, %p615_p12 }
  0x21   :  { %p618_p1 = pnand %p617_p0, %p611_p11 }
  0x23   :  { %621 = shalt.err (!%p618_p1)
}
  0x24   :  { %25 = dma.hbm_to_vmem [thread:$0]  %s848_s0, 128, %s23_s16, [#allocation3]  }
  0x25   :  { %s622_s30 = scalar_lea.hbm %s851_s3, 2048 }
  0x26   :  { %p623_p2 = scmp.ne.s32.totalorder %s851_s3, %s622_s30  ;;  %p626_p3 = scmp.lt.u32.totalorder %s622_s30, %s851_s3 }
  0x28   :  { %p628_p4 = pnand %p626_p3, %p623_p2 }
  0x2a   :  { %631 = shalt.err (!%p628_p4)
}
  0x2b   :  { %s632_s14 = scalar_lea.vmem %s46_s18, 2048  ;;  %p637_p6 = scmp.lt.s32.totalorder %s46_s18, %s46_s18 }
  0x2c   :  { %p633_p5 = scmp.ne.s32.totalorder %s46_s18, %s632_s14  ;;  %p638_p7 = scmp.lt.s32.totalorder %s632_s14, %s632_s14 }
  0x2e   :  { %p639_p8 = por %p638_p7, %p637_p6 }
  0x30   :  { %p640_p9 = pnand %p639_p8, %p633_p5 }
  0x32   :  { %643 = shalt.err (!%p640_p9)
}
  0x33   :  { %51 = dma.hbm_to_vmem [thread:$0]  %s851_s3, 2048, %s46_s18, [#allocation6], %s697_s11, %s697_s11, %s698_s12  }
  0x34   :  { %s701_s16 = smov [#allocation8]   ;;  %s644_s21 = scalar_lea.hbm %s853_s5, 2048 }
  0x35   :  { %s59_s17 = sshll.u32 %s701_s16, 4  ;;  %p645_p10 = scmp.ne.s32.totalorder %s853_s5, %s644_s21  ;;  %s60_s17 = int_to_ptr.vmem [resolvable:$true] %s59_s17 }
  0x36   :  { %p648_p11 = scmp.lt.u32.totalorder %s644_s21, %s853_s5 }
  0x38   :  { %p650_p12 = pnand %p648_p11, %p645_p10 }
  0x3a   :  { %653 = shalt.err (!%p650_p12)
}
  0x3b   :  { %s654_s1 = scalar_lea.vmem %s60_s17, 2048  ;;  %p659_p0 = scmp.lt.s32.totalorder %s60_s17, %s60_s17 }
  0x3c   :  { %p655_p13 = scmp.ne.s32.totalorder %s60_s17, %s654_s1  ;;  %p660_p1 = scmp.lt.s32.totalorder %s654_s1, %s654_s1 }
  0x3e   :  { %p661_p2 = por %p660_p1, %p659_p0 }
  0x40   :  { %p662_p3 = pnand %p661_p2, %p655_p13 }
  0x42   :  { %665 = shalt.err (!%p662_p3)
}
  0x43   :  { %65 = dma.hbm_to_vmem [thread:$0]  %s853_s5, 2048, %s60_s17, [#allocation9], %s697_s11, %s697_s11, %s698_s12  }
  0x44   :  { %688 = dma.done.wait [#allocation3], 128  }
  0x45   :  { %689 = vsyncadd [#allocation3], 4294967168 }
  0x46   :  { %690 = dma.done.wait [#allocation6], 2560  }
  0x47   :  { %691 = vsyncadd [#allocation6], 4294964736 }
  0x48   :  { %692 = dma.done.wait [#allocation9], 2048  }
  0x49   :  { %693 = vsyncadd [#allocation9], 4294965248  ;;  %v702_v0 = vmov 0.0|0.0   ;;  %vm703_vm0 = vmmov 0   ;;  %v704_v1 = vmov 0.0   ;;  %v81_v2 = vld [vmem:[#allocation5] sm:$0xff] }
  0x4a   :  { %508 = vmatprep.subr.bf16.mxu0 %v702_v0  ;;  %435 = vmatprep.mubr.msk.f32.mxu0 %vm703_vm0, %v704_v1  ;;  %v82_v3 = vld [vmem:[#allocation5 + $0x8] sm:$0xff]  ;;  %v83_v4 = vld [vmem:[#allocation5 + $0x10] sm:$0xff]  ;;  %v84_v6 = vld [vmem:[#allocation5 + $0x18] sm:$0xff]  ;;  %vm92_vm1 = vcmask 261120   ;;  %vm354_vm2 = vcmask 130048  }
  0x4b   :  { %514 = vmatprep.subr.bf16.mxu1 %v702_v0  ;;  %470 = vmatprep.mubr.msk.f32.mxu1 %vm703_vm0, %v704_v1  ;;  %v509_v5 = vpack.c.bf16 %v82_v3, %v81_v2  ;;  %v167_v7 = vld [vmem:[#allocation7] sm:$0xff]  ;;  %v168_v8 = vld [vmem:[#allocation7 + $0x8] sm:$0xff]  ;;  %v169_v9 = vld [vmem:[#allocation7 + $0x10] sm:$0xff]  ;;  %v512_v11 = vpack.c.bf16 %v84_v6, %v83_v4 }
  0x4c   :  { %v170_v10 = vld [vmem:[#allocation7 + $0x18] sm:$0xff]  ;;  %v515_v12 = vpack.c.bf16 %v168_v8, %v167_v7  ;;  %v171_v14 = vld [vmem:[#allocation7 + $0x20] sm:$0xff]  ;;  %v172_v15 = vld [vmem:[#allocation7 + $0x28] sm:$0xff] }
  0x4d   :  { %510 = vmatpush3.bf16.msra.mxu0 %v509_v5  ;;  %v518_v13 = vpack.c.bf16 %v170_v10, %v169_v9  ;;  %v80_v16 = vld [vmem:[#allocation2] sm:$0xff]  ;;  %v521_v17 = vpack.c.bf16 %v172_v15, %v171_v14  ;;  %v173_v18 = vld [vmem:[#allocation7 + $0x30] sm:$0xff]  ;;  %v175_v21 = vld [vmem:[#allocation7 + $0x40] sm:$0xff] }
  0x4e   :  { %511 = vmatprep.subr.bf16.mxu0 %v702_v0  ;;  %516 = vmatpush3.bf16.msra.mxu1 %v515_v12  ;;  %v174_v19 = vld [vmem:[#allocation7 + $0x38] sm:$0xff]  ;;  %v176_v22 = vld [vmem:[#allocation7 + $0x48] sm:$0xff]  ;;  %v177_v24 = vld [vmem:[#allocation7 + $0x50] sm:$0xff] }
  0x4f   :  { %517 = vmatprep.subr.bf16.mxu1 %v702_v0  ;;  %v524_v20 = vpack.c.bf16 %v174_v19, %v173_v18  ;;  %v527_v23 = vpack.c.bf16 %v176_v22, %v175_v21  ;;  %v178_v25 = vld [vmem:[#allocation7 + $0x58] sm:$0xff]  ;;  %v179_v27 = vld [vmem:[#allocation7 + $0x60] sm:$0xff]  ;;  %v180_v28 = vld [vmem:[#allocation7 + $0x68] sm:$0xff] }
  0x50   :  { %v530_v26 = vpack.c.bf16 %v178_v25, %v177_v24  ;;  %v533_v29 = vpack.c.bf16 %v180_v28, %v179_v27  ;;  %v181_v30 = vld [vmem:[#allocation7 + $0x70] sm:$0xff]  ;;  %v182_v31 = vld [vmem:[#allocation7 + $0x78] sm:$0xff]  ;;  %v261_v33 = vld [vmem:[#allocation8] sm:$0xff] }
  0x51   :  { %513 = vmatpush3.bf16.msra.mxu0 %v512_v11  ;;  %v536_v32 = vpack.c.bf16 %v182_v31, %v181_v30  ;;  %v262_v34 = vld [vmem:[#allocation8 + $0x8] sm:$0xff]  ;;  %v263_v35 = vld [vmem:[#allocation8 + $0x10] sm:$0xff]  ;;  %v264_v37 = vld [vmem:[#allocation8 + $0x18] sm:$0xff] }
  0x52   :  { %538 = vmatprep.subr.bf16.mxu0 %v702_v0  ;;  %519 = vmatpush3.bf16.msra.mxu1 %v518_v13  ;;  %v539_v36 = vpack.c.bf16 %v262_v34, %v261_v33  ;;  %v542_v38 = vpack.c.bf16 %v264_v37, %v263_v35  ;;  %v265_v39 = vld [vmem:[#allocation8 + $0x20] sm:$0xff]  ;;  %v266_v40 = vld [vmem:[#allocation8 + $0x28] sm:$0xff]  ;;  %v267_v42 = vld [vmem:[#allocation8 + $0x30] sm:$0xff] }
  0x53   :  { %520 = vmatprep.subr.bf16.mxu1 %v702_v0  ;;  %v545_v41 = vpack.c.bf16 %v266_v40, %v265_v39  ;;  %v268_v43 = vld [vmem:[#allocation8 + $0x38] sm:$0xff]  ;;  %v269_v45 = vld [vmem:[#allocation8 + $0x40] sm:$0xff]  ;;  %v270_v46 = vld [vmem:[#allocation8 + $0x48] sm:$0xff] }
  0x54   :  { %436 = vmatmul.mubr.msk.f32.vlgmr.msra.gmra.mrb[0].mxu0 %vm92_vm1, %v80_v16  ;;  %v548_v44 = vpack.c.bf16 %v268_v43, %v267_v42  ;;  %v551_v47 = vpack.c.bf16 %v270_v46, %v269_v45  ;;  %v384_v48 = vld [vmem:[%s850_s2] ss:$0 sm:$0xff]  ;;  %v271_v53 = vld [vmem:[#allocation8 + $0x50] sm:$0xff]  ;;  %v273_v56 = vld [vmem:[#allocation8 + $0x60] sm:$0xff] }
  0x55   :  { %505 = vmatprep.mubr.msk.f32.mxu0 %vm703_vm0, %v704_v1  ;;  %540 = vmatpush3.bf16.msra.mxu0 %v539_v36  ;;  %v272_v54 = vld [vmem:[#allocation8 + $0x58] sm:$0xff]  ;;  %v274_v57 = vld [vmem:[#allocation8 + $0x68] sm:$0xff]  ;;  %v275_v59 = vld [vmem:[#allocation8 + $0x70] sm:$0xff] }
  0x56   :  { %522 = vmatpush3.bf16.msra.mxu1 %v521_v17  ;;  %541 = vmatprep.subr.bf16.mxu0 %v702_v0  ;;  %v554_v55 = vpack.c.bf16 %v272_v54, %v271_v53  ;;  %v557_v58 = vpack.c.bf16 %v274_v57, %v273_v56  ;;  %v276_v60 = vld [vmem:[#allocation8 + $0x78] sm:$0xff] }
  0x57   :  { %523 = vmatprep.subr.bf16.mxu1 %v702_v0  ;;  %v560_v61 = vpack.c.bf16 %v276_v60, %v275_v59  ;;  %v386_v62 = vld [vmem:[%s852_s4] ss:$0 sm:$0xff]  ;;  %s705_s4 = smov [#allocation10]  }
  0x58   :  { %v387_v4 = vld [vmem:[%s854_s6] ss:$0 sm:$0xff]  ;;  %s373_s28 = sshll.u32 %s705_s4, 4  ;;  %s374_s28 = int_to_ptr.vmem [resolvable:$true] %s373_s28 }
  0x59   :  { %543 = vmatpush3.bf16.msra.mxu0 %v542_v38  ;;  %s666_s6 = scalar_lea.vmem %s374_s28, 128  ;;  %p671_p5 = scmp.lt.s32.totalorder %s374_s28, %s374_s28 }
  0x5a   :  { %525 = vmatpush3.bf16.msra.mxu1 %v524_v20  ;;  %544 = vmatprep.subr.bf16.mxu0 %v702_v0  ;;  %p667_p4 = scmp.ne.s32.totalorder %s374_s28, %s666_s6  ;;  %p672_p6 = scmp.lt.s32.totalorder %s666_s6, %s666_s6 }
  0x5b   :  { %526 = vmatprep.subr.bf16.mxu1 %v702_v0 }
  0x5c   :  { %p673_p7 = por %p672_p6, %p671_p5 }
  0x5d   :  { %546 = vmatpush3.bf16.msra.mxu0 %v545_v41 }
  0x5e   :  { %528 = vmatpush3.bf16.msra.mxu1 %v527_v23  ;;  %547 = vmatprep.subr.bf16.mxu0 %v702_v0  ;;  %p674_p8 = pnand %p673_p7, %p667_p4 }
  0x5f   :  { %529 = vmatprep.subr.bf16.mxu1 %v702_v0 }
  0x61   :  { %549 = vmatpush3.bf16.msra.mxu0 %v548_v44 }
  0x62   :  { %531 = vmatpush3.bf16.msra.mxu1 %v530_v26  ;;  %550 = vmatprep.subr.bf16.mxu0 %v702_v0 }
  0x63   :  { %532 = vmatprep.subr.bf16.mxu1 %v702_v0 }
  0x65   :  { %552 = vmatpush3.bf16.msra.mxu0 %v551_v47 }
  0x66   :  { %534 = vmatpush3.bf16.msra.mxu1 %v533_v29  ;;  %553 = vmatprep.subr.bf16.mxu0 %v702_v0 }
  0x67   :  { %535 = vmatprep.subr.bf16.mxu1 %v702_v0 }
  0x69   :  { %555 = vmatpush3.bf16.msra.mxu0 %v554_v55 }
  0x6a   :  { %537 = vmatpush3.bf16.msra.mxu1 %v536_v32  ;;  %556 = vmatprep.subr.bf16.mxu0 %v702_v0 }
  0x6d   :  { %558 = vmatpush3.bf16.msra.mxu0 %v557_v58 }
  0x6e   :  { %559 = vmatprep.subr.bf16.mxu0 %v702_v0 }
  0x71   :  { %561 = vmatpush3.bf16.msra.mxu0 %v560_v61 }
 0x127   :  { %v162_v49 = vpop.f32.mrb[0].mxu0 }
 0x128   :  { %v163_v50 = vadd.f32 %v384_v48, %v162_v49  ;;  %v437_v51 = vpop.f32.mrb[1].mxu0 }
 0x12a   :  { %v166_v52 = vmax.f32 %v163_v50, 0.0 }
 0x12c   :  { %471 = vmatmul.mubr.f32.vlgmr.msra.gmra.mrb[0].mxu1 %v166_v52 }
 0x1ff   :  { %v256_v63 = vpop.f32.mrb[0].mxu1 }
 0x200   :  { %v257_v1 = vadd.f32 %v386_v62, %v256_v63  ;;  %v472_v2 = vpop.f32.mrb[1].mxu1 }
 0x202   :  { %572 = vtanh.f32 %v257_v1 }
 0x20c   :  { %v573_v3 = vpop.eup %572 }
 0x20d   :  { %506 = vmatmul.mubr.f32.vlgmr.msra.gmra.mrb[2].mxu0 %v573_v3 }
 0x2e0   :  { %v350_v5 = vpop.f32.mrb[2].mxu0 }
 0x2e1   :  { %v351_v6 = vadd.f32 %v387_v4, %v350_v5  ;;  %v507_v7 = vpop.f32.mrb[3].mxu0 }
 0x2e3   :  { %v355_v0 = vsel %vm354_vm2, %v351_v6, -inf }
 0x2e4   :  { %356 = vmax.xlane.f32.xlu0 %v355_v0 }
 0x371   :  { %v357_v8 = vpop.xlane.xlu0 %356 }
 0x372   :  { %v358_v9 = vsub.f32 %v351_v6, %v357_v8 }
 0x374   :  { %v359_v10 = vmul.f32 1.442695, %v358_v9 }
 0x376   :  { %574 = vpow2.f32 %v359_v10 }
 0x380   :  { %v575_v11 = vpop.eup %574 }
 0x381   :  { %v361_v12 = vsel %vm354_vm2, %v575_v11, 0.0 }
 0x382   :  { %362 = vadd.xlane.f32.xlu0 %v361_v12 }
 0x40f   :  { %v363_v13 = vpop.xlane.xlu0 %362 }
 0x410   :  { %576 = vrcp.f32 %v363_v13 }
 0x41a   :  { %v577_v14 = vpop.eup %576 }
 0x41b   :  { %v365_v15 = vmul.f32 %v577_v14, %v575_v11 }
 0x41d   :  { %366 = vst.msk [vmem:[#allocation10] sm:$0xff] %vm354_vm2, %v365_v15 }
 0x41e   :  { %677 = shalt.err (!%p674_p8)
}
 0x41f   :  { %s678_s8 = scalar_lea.hbm %s855_s7, 128 }
 0x420   :  { %p679_p9 = scmp.ne.s32.totalorder %s855_s7, %s678_s8  ;;  %p682_p10 = scmp.lt.u32.totalorder %s678_s8, %s855_s7 }
 0x422   :  { %p684_p11 = pnand %p682_p10, %p679_p9 }
 0x424   :  { %687 = shalt.err (!%p684_p11)
}
 0x425   :  { %376 = dma.vmem_to_hbm [thread:$0]  %s374_s28, 128, %s855_s7, [#allocation4]  }
 0x426   :  { %694 = dma.done.wait [#allocation4], 128  }
 0x427   :  { %695 = vsyncadd [#allocation4], 4294967168 }
 0x428   :  { %380 = vsyncpa [#allocation3], 1 }
 0x429   :  { %381 = vsyncpa [#allocation6], 1 }
 0x42a   :  { %382 = vsyncpa [#allocation9], 1 }
 0x42b   :  { %383 = vsyncpa [#allocation4], 1 }

</bundles_post_ra>
